<compile_context>
chip_gen: v5e
topology: v5e:2x2
jax: 0.10.0
libtpu: 0.0.40
codegen_flags: <defaults>
</compile_context>

<pallas_src>
import functools

import jax
import jax.numpy as jnp
from jax.experimental import pallas as pl
from jax.experimental.pallas import tpu as pltpu


def ensemble_kernel(x_ref, w_ref, b_ref, o_ref, *, num_models, in_features):
    # x_ref: (Bt, D) f32, w_ref: (M*D, O) bf16, b_ref: (M, O) f32, o_ref: (Bt, O) f32
    x = x_ref[...].astype(jnp.bfloat16)   # tiny VPU cast; MXU-native bf16 input
    b = b_ref[...]                        # (M, O) f32, whole thing is one vreg row-group

    acc = None
    for m in range(num_models):
        # Static, tile-aligned K-slice of the packed weights (no relayout).
        w_m = w_ref[pl.ds(m * in_features, in_features), :]        # (D, O) bf16
        logits = jnp.dot(x, w_m, preferred_element_type=jnp.float32) + b[m]
        p = jax.nn.sigmoid(logits)                                  # f32 on EUP/VPU
        acc = p if acc is None else acc + p
    o_ref[...] = (acc * (1.0 / num_models)).astype(o_ref.dtype)


def pack_ensemble_params(w_stack, b_stack):
    """One-time (init-time) packing, hoisted out of the forward path.

    [M, D, O] -> [M*D, O] is a free reshape of a contiguous array (no HBM
    transpose); the bf16 cast halves the dominant weight DMA.
    """
    M, D, O = w_stack.shape
    w_packed = w_stack.reshape(M * D, O).astype(jnp.bfloat16)
    b_packed = b_stack.astype(jnp.float32)
    return w_packed, b_packed


def ensemble_forward(x, w_packed, b_packed, *, block_b=512):
    B, D = x.shape
    MD, O = w_packed.shape
    M = b_packed.shape[0]
    assert MD == M * D

    kernel = functools.partial(ensemble_kernel, num_models=M, in_features=D)
    cost = pl.CostEstimate(
        flops=int(2 * B * D * M * O),
        transcendentals=int(B * M * O),
        bytes_accessed=int(x.size * x.dtype.itemsize
                           + w_packed.size * w_packed.dtype.itemsize
                           + b_packed.size * b_packed.dtype.itemsize
                           + B * O * 4),
    )
    out_shape = jax.ShapeDtypeStruct((B, O), jnp.float32)

    if B <= block_b:
        # Small batch: single invocation, no grid, no pipelining machinery.
        # Everything (x, packed W, bias, out) is resident in VMEM once.
        return pl.pallas_call(
            kernel,
            out_shape=out_shape,
            in_specs=[
                pl.BlockSpec(memory_space=pltpu.MemorySpace.VMEM),   # x
                pl.BlockSpec(memory_space=pltpu.MemorySpace.VMEM),   # packed W
                pl.BlockSpec(memory_space=pltpu.MemorySpace.VMEM),   # bias
            ],
            out_specs=pl.BlockSpec(memory_space=pltpu.MemorySpace.VMEM),
            cost_estimate=cost,
        )(x, w_packed, b_packed)

    # Large batch: tile B with "parallel" semantics (megacore sharding on
    # v7x).  W/bias index maps are constant -> weight slab stays resident.
    bb = block_b
    return pl.pallas_call(
        kernel,
        out_shape=out_shape,
        grid=(pl.cdiv(B, bb),),
        in_specs=[
            pl.BlockSpec((bb, D), lambda i: (i, 0)),     # x tile
            pl.BlockSpec((MD, O), lambda i: (0, 0)),     # packed W, resident
            pl.BlockSpec((M, O), lambda i: (0, 0)),      # bias, resident
        ],
        out_specs=pl.BlockSpec((bb, O), lambda i: (i, 0)),
        compiler_params=pltpu.CompilerParams(
            dimension_semantics=("parallel",)),
        cost_estimate=cost,
    )(x, w_packed, b_packed)


def ensemble_reference(x, w_stack, b_stack):
    preds = jax.nn.sigmoid(
        jnp.einsum("bd,mdo->mbo", x, w_stack) + b_stack[:, None, :])
    return jnp.mean(preds, axis=0)


if __name__ == "__main__":
    B, D, O, M = 8, 32, 128, 3  # batch, in-features, out-features, num models

    key = jax.random.PRNGKey(0)
    kx, kw, kb, kx2 = jax.random.split(key, 4)
    x = jax.random.normal(kx, (B, D), dtype=jnp.float32)
    # Deterministic synthetic parameters for the M member models.
    w_stack = jax.random.normal(kw, (M, D, O), dtype=jnp.float32) * 0.1
    b_stack = jax.random.normal(kb, (M, O), dtype=jnp.float32) * 0.1

    # Init-time packing (free reshape + bf16 cast), done once, not per call.
    w_packed, b_packed = pack_ensemble_params(w_stack, b_stack)
    w_packed, b_packed = jax.block_until_ready((w_packed, b_packed))

    # Small-batch (no-grid) path.
    out = ensemble_forward(x, w_packed, b_packed)
    jax.block_until_ready(out)
    ref = ensemble_reference(x, w_stack, b_stack)
    assert out.shape == (B, O)
    assert jnp.allclose(out, ref, atol=1e-2, rtol=1e-2), float(
        jnp.max(jnp.abs(out - ref)))

    # Tiled / parallel-B path at a larger batch.
    B2 = 1024
    x2 = jax.random.normal(kx2, (B2, D), dtype=jnp.float32)
    out2 = ensemble_forward(x2, w_packed, b_packed)
    jax.block_until_ready(out2)
    ref2 = ensemble_reference(x2, w_stack, b_stack)
    assert out2.shape == (B2, O)
    assert jnp.allclose(out2, ref2, atol=1e-2, rtol=1e-2), float(
        jnp.max(jnp.abs(out2 - ref2)))

    print("KERNEL_OK")
</pallas_src>

<mosaic_0001>
module attributes {stable_mosaic.version = 11 : i64} {
  func.func @ensemble_kernel(%arg0: memref<8x32xf32, #tpu.memory_space<vmem>>, %arg1: memref<96x128xbf16, #tpu.memory_space<vmem>>, %arg2: memref<3x128xf32, #tpu.memory_space<vmem>>, %arg3: memref<8x128xf32, #tpu.memory_space<vmem>>) attributes {dimension_semantics = [], scalar_prefetch = 0 : i64, scratch_operands = 0 : i64, tpu.core_type = #tpu.core_type<tc>} {
    %c0 = arith.constant 0 : index
    %c0_0 = arith.constant 0 : index
    %0 = vector.load %arg0[%c0, %c0_0] : memref<8x32xf32, #tpu.memory_space<vmem>>, vector<8x32xf32>
    %1 = arith.truncf %0 : vector<8x32xf32> to vector<8x32xbf16>
    %c0_1 = arith.constant 0 : index
    %c0_2 = arith.constant 0 : index
    %2 = vector.load %arg2[%c0_1, %c0_2] : memref<3x128xf32, #tpu.memory_space<vmem>>, vector<3x128xf32>
    %c0_3 = arith.constant 0 : index
    %c0_4 = arith.constant 0 : index
    %3 = vector.load %arg1[%c0_3, %c0_4] : memref<96x128xbf16, #tpu.memory_space<vmem>>, vector<32x128xbf16>
    %cst = arith.constant dense<0.000000e+00> : vector<8x128xf32>
    %4 = tpu.matmul %1, %3, %cst {dimension_numbers = #tpu.dot_dimension_numbers<[1], [0], [0], [1], [0, 0, 1, 1], [], []>} : vector<8x32xbf16>, vector<32x128xbf16>, vector<8x128xf32> -> vector<8x128xf32>
    %5 = vector.extract_strided_slice %2 {offsets = [0, 0], sizes = [1, 128], strides = [1, 1]} : vector<3x128xf32> to vector<1x128xf32>
    %6 = vector.shape_cast %5 : vector<1x128xf32> to vector<128xf32>
    %7 = vector.shape_cast %6 : vector<128xf32> to vector<1x128xf32>
    %8 = vector.broadcast %7 : vector<1x128xf32> to vector<8x128xf32>
    %9 = arith.addf %4, %8 : vector<8x128xf32>
    %10 = arith.negf %9 : vector<8x128xf32>
    %11 = math.exp %10 : vector<8x128xf32>
    %cst_5 = arith.constant 1.000000e+00 : f32
    %12 = vector.broadcast %cst_5 : f32 to vector<8x128xf32>
    %13 = arith.addf %12, %11 : vector<8x128xf32>
    %14 = arith.divf %12, %13 : vector<8x128xf32>
    %c32 = arith.constant 32 : index
    %c0_6 = arith.constant 0 : index
    %15 = vector.load %arg1[%c32, %c0_6] : memref<96x128xbf16, #tpu.memory_space<vmem>>, vector<32x128xbf16>
    %cst_7 = arith.constant dense<0.000000e+00> : vector<8x128xf32>
    %16 = tpu.matmul %1, %15, %cst_7 {dimension_numbers = #tpu.dot_dimension_numbers<[1], [0], [0], [1], [0, 0, 1, 1], [], []>} : vector<8x32xbf16>, vector<32x128xbf16>, vector<8x128xf32> -> vector<8x128xf32>
    %17 = vector.extract_strided_slice %2 {offsets = [1, 0], sizes = [1, 128], strides = [1, 1]} : vector<3x128xf32> to vector<1x128xf32>
    %18 = vector.shape_cast %17 : vector<1x128xf32> to vector<128xf32>
    %19 = vector.shape_cast %18 : vector<128xf32> to vector<1x128xf32>
    %20 = vector.broadcast %19 : vector<1x128xf32> to vector<8x128xf32>
    %21 = arith.addf %16, %20 : vector<8x128xf32>
    %22 = arith.negf %21 : vector<8x128xf32>
    %23 = math.exp %22 : vector<8x128xf32>
    %cst_8 = arith.constant 1.000000e+00 : f32
    %24 = vector.broadcast %cst_8 : f32 to vector<8x128xf32>
    %25 = arith.addf %24, %23 : vector<8x128xf32>
    %26 = arith.divf %24, %25 : vector<8x128xf32>
    %27 = arith.addf %14, %26 : vector<8x128xf32>
    %c64 = arith.constant 64 : index
    %c0_9 = arith.constant 0 : index
    %28 = vector.load %arg1[%c64, %c0_9] : memref<96x128xbf16, #tpu.memory_space<vmem>>, vector<32x128xbf16>
    %cst_10 = arith.constant dense<0.000000e+00> : vector<8x128xf32>
    %29 = tpu.matmul %1, %28, %cst_10 {dimension_numbers = #tpu.dot_dimension_numbers<[1], [0], [0], [1], [0, 0, 1, 1], [], []>} : vector<8x32xbf16>, vector<32x128xbf16>, vector<8x128xf32> -> vector<8x128xf32>
    %30 = vector.extract_strided_slice %2 {offsets = [2, 0], sizes = [1, 128], strides = [1, 1]} : vector<3x128xf32> to vector<1x128xf32>
    %31 = vector.shape_cast %30 : vector<1x128xf32> to vector<128xf32>
    %32 = vector.shape_cast %31 : vector<128xf32> to vector<1x128xf32>
    %33 = vector.broadcast %32 : vector<1x128xf32> to vector<8x128xf32>
    %34 = arith.addf %29, %33 : vector<8x128xf32>
    %35 = arith.negf %34 : vector<8x128xf32>
    %36 = math.exp %35 : vector<8x128xf32>
    %cst_11 = arith.constant 1.000000e+00 : f32
    %37 = vector.broadcast %cst_11 : f32 to vector<8x128xf32>
    %38 = arith.addf %37, %36 : vector<8x128xf32>
    %39 = arith.divf %37, %38 : vector<8x128xf32>
    %40 = arith.addf %27, %39 : vector<8x128xf32>
    %cst_12 = arith.constant 0.333333343 : f32
    %41 = vector.broadcast %cst_12 : f32 to vector<8x128xf32>
    %42 = arith.mulf %40, %41 : vector<8x128xf32>
    %c0_13 = arith.constant 0 : index
    %c0_14 = arith.constant 0 : index
    %43 = vector.load %arg3[%c0_13, %c0_14] : memref<8x128xf32, #tpu.memory_space<vmem>>, vector<8x128xf32>
    tpu.vector_store %arg3[%c0_13, %c0_14], %42 {strides = array<i32>} : memref<8x128xf32, #tpu.memory_space<vmem>>, vector<8x128xf32>,
    return
  }
}

</mosaic_0001>

<bundles_post_ra>
// kernel: tpu_custom_call.1
= control target key start
LH: loop header
LB: loop body
LE: loop exit
PB: predicated region body
PF: predicated region fallthrough
CT: control target
= control target key end

     0   :  { %8 = vsyncpa [#allocation3], 0  ;;  %s435_s0 = inlined_call_operand.hbm [shape: f32[8,32], index: 0, kind: input, shape index: {}]   ;;  %s436_s1 = inlined_call_operand.hbm [shape: bf16[96,128], index: 1, kind: input, shape index: {}]   ;;  %s437_s2 = inlined_call_operand.hbm [shape: f32[3,128], index: 2, kind: input, shape index: {}]   ;;  %s438_s3 = inlined_call_operand.hbm [shape: f32[8,128], index: 3, kind: output, shape index: {}]  }
   0x1   :  { %9 = vsyncpa [#allocation6], 0  ;;  %s26_s14 = sshll.u32 %s436_s1, 4  ;;  %s27_s14 = int_to_ptr.hbm [resolvable:$true] %s26_s14 }
   0x2   :  { %10 = vsyncpa [#allocation4], 0  ;;  %s391_s15 = smov [#allocation5]   ;;  %s16_s19 = sshll.u32 %s435_s0, 4  ;;  %s17_s19 = int_to_ptr.hbm [resolvable:$true] %s16_s19 }
   0x3   :  { %s28_s16 = sshll.u32 %s391_s15, 4  ;;  %s392_s20 = smov 64   ;;  %s29_s16 = int_to_ptr.vmem [resolvable:$true] %s28_s16 }
   0x4   :  { %s393_s21 = smov 4   ;;  %s394_s22 = smov [#allocation2]  }
   0x5   :  { %34 = dma.hbm_to_vmem [thread:$0]  %s27_s14, 768, %s29_s16, [#allocation6], %s392_s20, %s392_s20, %s393_s21  }
   0x6   :  { %s18_s23 = sshll.u32 %s394_s22, 4  ;;  %s40_s26 = sshll.u32 %s437_s2, 4  ;;  %s19_s23 = int_to_ptr.vmem [resolvable:$true] %s18_s23  ;;  %s41_s26 = int_to_ptr.hbm [resolvable:$true] %s40_s26 }
   0x7   :  { %21 = dma.hbm_to_vmem [thread:$0]  %s17_s19, 128, %s19_s23, [#allocation3]  }
   0x8   :  { %s395_s1 = smov [#allocation7]  }
   0x9   :  { %s42_s27 = sshll.u32 %s395_s1, 4  ;;  %s43_s27 = int_to_ptr.vmem [resolvable:$true] %s42_s27 }
   0xa   :  { %45 = dma.hbm_to_vmem [thread:$0]  %s41_s26, 64, %s43_s27, [#allocation6]  }
   0xb   :  { %385 = dma.done.wait [#allocation3], 128  }
   0xc   :  { %386 = vsyncadd [#allocation3], 4294967168 }
   0xd   :  { %387 = dma.done.wait [#allocation6], 832  }
   0xe   :  { %388 = vsyncadd [#allocation6], 4294966464  ;;  %v266_v0 = vld [vmem:[#allocation5 + $0x8] sm:$0xff]  ;;  %v268_v1 = vld [vmem:[#allocation5 + $0x18] sm:$0xff]  ;;  %vm79_vm0 = vcmask 261120   ;;  %s396_s0 = smov [#allocation8]  }
   0xf   :  { %v270_v2 = vld [vmem:[#allocation5 + $0x28] sm:$0xff]  ;;  %89 = vmatpush.bf16.msra.mxu0 %v266_v0  ;;  %138 = vmatpush.bf16.msra.mxu1 %v268_v1  ;;  %v265_v3 = vld [vmem:[#allocation5] sm:$0xff]  ;;  %v267_v4 = vld [vmem:[#allocation5 + $0x10] sm:$0xff]  ;;  %s222_s2 = sshll.u32 %s396_s0, 4  ;;  %s224_s30 = sshll.u32 %s438_s3, 4  ;;  %s223_s2 = int_to_ptr.vmem [resolvable:$true] %s222_s2  ;;  %s225_s30 = int_to_ptr.hbm [resolvable:$true] %s224_s30 }
  0x10   :  { %v59_v5 = vld [vmem:[#allocation2] sm:$0xff]  ;;  %188 = vmatpush.bf16.msra.mxu2 %v270_v2  ;;  %v269_v6 = vld [vmem:[#allocation5 + $0x20] sm:$0xff]  ;;  %v61_v8 = vld [vmem:[#allocation7] sm:$0x7] }
  0x11   :  { %v60_v7 = vpack.c.bf16 %v59_v5, %v59_v5  ;;  %v66_v9 = vperm.slane %v61_v8, 0  ;;  %v119_v10 = vperm.slane %v61_v8, 1  ;;  %v169_v17 = vperm.slane %v61_v8, 2 }
  0x13   :  { %90 = vmatpush.bf16.msra.mxu0 %v265_v3  ;;  %139 = vmatpush.bf16.msra.mxu1 %v267_v4 }
  0x14   :  { %189 = vmatpush.bf16.msra.mxu2 %v269_v6 }
  0x16   :  { %243 = vmatmul.msk.bf16.vlgmr.msra.gmra.mxu0 %vm79_vm0, %v60_v7  ;;  %253 = vmatmul.msk.bf16.vlgmr.msra.gmra.mxu1 %vm79_vm0, %v60_v7 }
  0x17   :  { %263 = vmatmul.msk.bf16.vlgmr.msra.gmra.mxu2 %vm79_vm0, %v60_v7 }
  0x93   :  { %v92_v11 = vpop.f32.mrf.mxu0  ;;  %v141_v12 = vpop.f32.mrf.mxu1 }
  0x94   :  { %v93_v13 = vadd.f32 %v92_v11, %v66_v9  ;;  %v142_v14 = vadd.f32 %v141_v12, %v119_v10 }
  0x96   :  { %v244_v15 = vmul.f32 -1.442695, %v93_v13  ;;  %v254_v16 = vmul.f32 -1.442695, %v142_v14 }
  0x98   :  { %277 = vpow2.f32 %v244_v15 }
  0x99   :  { %279 = vpow2.f32 %v254_v16 }
  0x9a   :  { %v191_v18 = vpop.f32.mrf.mxu2 }
  0x9b   :  { %v192_v19 = vadd.f32 %v191_v18, %v169_v17  ;;  %v94_v20 = vpop.f32.mrf.mxu0  ;;  %v143_v21 = vpop.f32.mrf.mxu1 }
  0x9d   :  { %v264_v22 = vmul.f32 -1.442695, %v192_v19 }
  0x9e   :  { %v278_v23 = vpop.eup %277 }
  0x9f   :  { %v280_v24 = vpop.eup %279  ;;  %v99_v25 = vadd.f32 1.0, %v278_v23  ;;  %281 = vpow2.f32 %v264_v22 }
  0xa0   :  { %v148_v26 = vadd.f32 1.0, %v280_v24 }
  0xa1   :  { %283 = vrcp.f32 %v99_v25  ;;  %vm105_vm2 = vweird.f32 %v99_v25  ;;  %v109_v40 = vand.u32 2147483647, %v99_v25  ;;  %v111_v41 = vand.u32 2147483648, %v99_v25 }
  0xa2   :  { %285 = vrcp.f32 %v148_v26  ;;  %v193_v27 = vpop.f32.mrf.mxu2  ;;  %v160_v42 = vand.u32 2147483648, %v148_v26  ;;  %vm154_vm5 = vweird.f32 %v148_v26  ;;  %v158_v46 = vand.u32 2147483647, %v148_v26 }
  0xa3   :  { %vm110_vm7 = vcmp.eq.f32.partialorder %v109_v40, 8.507059e+37  ;;  %v112_v50 = vor.u32 1.1754944e-38, %v111_v41 }
  0xa4   :  { %v161_v51 = vor.u32 1.1754944e-38, %v160_v42  ;;  %vm159_vm8 = vcmp.eq.f32.partialorder %v158_v46, 8.507059e+37 }
  0xa5   :  { %v282_v28 = vpop.eup %281 }
  0xa6   :  { %v198_v29 = vadd.f32 1.0, %v282_v28 }
  0xa7   :  { %v284_v30 = vpop.eup %283 }
  0xa8   :  { %v286_v31 = vpop.eup %285  ;;  %v101_v32 = vmul.f32 %v284_v30, %v99_v25  ;;  %287 = vrcp.f32 %v198_v29  ;;  %vm106_vm1 = vweird.f32 %v284_v30  ;;  %v210_v52 = vand.u32 2147483648, %v198_v29 }
  0xa9   :  { %v150_v33 = vmul.f32 %v286_v31, %v148_v26  ;;  %vm155_vm3 = vweird.f32 %v286_v31  ;;  %vm426_vm4 = vmor %vm105_vm2, %vm106_vm1  ;;  %v208_v54 = vand.u32 2147483647, %v198_v29  ;;  %vm204_vm10 = vweird.f32 %v198_v29 }
  0xaa   :  { %v102_v34 = vsub.f32 1.0, %v101_v32  ;;  %vm156_vm6 = vmor %vm154_vm5, %vm155_vm3  ;;  %v211_v58 = vor.u32 1.1754944e-38, %v210_v52 }
  0xab   :  { %v151_v35 = vsub.f32 1.0, %v150_v33  ;;  %vm209_vm12 = vcmp.eq.f32.partialorder %v208_v54, 8.507059e+37 }
  0xac   :  { %v103_v36 = vmul.f32 %v284_v30, %v102_v34 }
  0xad   :  { %v152_v37 = vmul.f32 %v286_v31, %v151_v35 }
  0xae   :  { %v288_v38 = vpop.eup %287  ;;  %v104_v39 = vadd.f32 %v284_v30, %v103_v36 }
  0xaf   :  { %v200_v43 = vmul.f32 %v288_v38, %v198_v29  ;;  %v153_v45 = vadd.f32 %v286_v31, %v152_v37  ;;  %vm205_vm9 = vweird.f32 %v288_v38 }
  0xb0   :  { %v108_v48 = vsel %vm426_vm4, %v284_v30, %v104_v39  ;;  %vm206_vm11 = vmor %vm204_vm10, %vm205_vm9 }
  0xb1   :  { %v201_v47 = vsub.f32 1.0, %v200_v43  ;;  %v157_v49 = vsel %vm156_vm6, %v286_v31, %v153_v45  ;;  %v113_v55 = vsel %vm110_vm7, %v112_v50, %v108_v48 }
  0xb2   :  { %v162_v56 = vsel %vm159_vm8, %v161_v51, %v157_v49 }
  0xb3   :  { %v202_v53 = vmul.f32 %v288_v38, %v201_v47  ;;  %v164_v59 = vadd.f32 %v162_v56, %v113_v55 }
  0xb5   :  { %v203_v57 = vadd.f32 %v288_v38, %v202_v53 }
  0xb7   :  { %v207_v60 = vsel %vm206_vm11, %v288_v38, %v203_v57 }
  0xb8   :  { %v212_v61 = vsel %vm209_vm12, %v211_v58, %v207_v60 }
  0xb9   :  { %v214_v62 = vadd.f32 %v212_v61, %v164_v59 }
  0xbb   :  { %v215_v63 = vmul.f32 0.33333334, %v214_v62 }
  0xbd   :  { %216 = vst [vmem:[#allocation8] sm:$0xff] %v215_v63 }
  0xbe   :  { %227 = dma.vmem_to_hbm [thread:$0]  %s223_s2, 128, %s225_s30, [#allocation4]  }
  0xbf   :  { %389 = dma.done.wait [#allocation4], 128  }
  0xc0   :  { %390 = vsyncadd [#allocation4], 4294967168 }
  0xc1   :  { %232 = vsyncpa [#allocation3], 1 }
  0xc2   :  { %233 = vsyncpa [#allocation6], 1 }
  0xc3   :  { %234 = vsyncpa [#allocation4], 1 }

</bundles_post_ra>
